<compile_context>
chip_gen: v7x
topology: tpu7x:2x2x1
jax: 0.10.0
libtpu: 0.0.40
codegen_flags: <defaults>
</compile_context>

<pallas_src>
import functools

import jax
import jax.numpy as jnp
from jax.experimental import pallas as pl
from jax.experimental.pallas import tpu as pltpu

SMOOTHING = 0.1


def _ls_ce_kernel(x_ref, tgt_ref, loss_ref, *, smoothing, confidence, inv_c):
    # x_ref: (TB, C) logits (any float dtype), tgt_ref: (TB, 1) int32,
    # loss_ref: (TB, 1) f32 per-row smoothed loss.
    x = x_ref[...]                                    # native dtype (bf16 stays bf16)

    # Max / subtract in the input dtype (2x VPU rate for bf16 on v6e/v7x, and no
    # up-front f32 copy of the whole tile); cast once for exp + accumulation.
    m = jnp.max(x, axis=-1, keepdims=True)            # (TB, 1)
    shifted = (x - m).astype(jnp.float32)             # (TB, C) f32

    # Numerically stable log-sum-exp (no full logprobs tensor is materialized).
    lse = jnp.log(jnp.sum(jnp.exp(shifted), axis=-1, keepdims=True))   # (TB, 1)

    # Fused gather + mean:  with w_c = smoothing/C + confidence*[c == target]
    # (so sum_c w_c == 1):
    #   confidence*(lse - shifted[tgt]) + smoothing*(lse - mean(shifted))
    #     = lse - sum_c w_c * shifted_c
    # One (TB, C) lane reduction, no dynamic gather.  Assumes valid class
    # indices in [0, C) (the PyTorch module has no ignore_index).
    tgt = tgt_ref[...]                                                 # (TB, 1) int32
    col = jax.lax.broadcasted_iota(jnp.int32, (1, shifted.shape[-1]), 1)  # (1, C)
    w = jnp.where(col == tgt, confidence + smoothing * inv_c, smoothing * inv_c)
    combined = jnp.sum(w * shifted, axis=-1, keepdims=True)            # (TB, 1)

    loss_ref[...] = lse - combined


def _round_up(x, m):
    return ((x + m - 1) // m) * m


def _vmem_capacity_bytes():
    try:
        cap = int(pltpu.get_tpu_info().vmem_capacity_bytes)
        if cap > 0:
            return cap
    except Exception:
        pass
    return 64 * 2**20   # conservative v7x-sized fallback


def _pick_block_rows(N, C, itemsize, sub, vmem_cap):
    """VMEM-budgeted row-tile size (multiple of the sublane packing `sub`)."""
    # Working-set budget ~3/8 of physical VMEM (24 MiB on v7x, 48 MiB on
    # v5e/v6e) leaves headroom for Pallas double buffers / compiler scratch.
    budget = (vmem_cap * 3) // 8
    # Per-row footprint: double-buffered x tile + ~3 f32-sized live temporaries.
    per_row = C * (2 * itemsize + 12) + 64
    rows = max(sub, (budget // per_row) // sub * sub)

    # Aim for >= ~4 MiB of x per grid step so the ~0.35 us per-step overhead is
    # amortized and the kernel stays HBM-streaming bound even at small C.
    target = _round_up(max(sub, pl.cdiv(4 * 2**20, C * itemsize)), sub)
    rows = min(rows, target, 4096)

    # Keep >= 2 grid steps when N allows so the "parallel" axis feeds both v7x
    # TensorCores (harmless extra steps on single-TC v5e/v6e).
    n_sub = _round_up(N, sub)
    if n_sub >= 2 * sub:
        rows = min(rows, max(sub, (n_sub // 2) // sub * sub))
    rows = max(sub, min(rows, n_sub))

    # Re-balance block size so the last block is not mostly padding.
    num_blocks = pl.cdiv(N, rows)
    rows = max(sub, _round_up(pl.cdiv(N, num_blocks), sub))
    return rows


def label_smoothing_cross_entropy(x, target, *, smoothing=SMOOTHING):
    """x: (N, C) float logits, target: (N,) int class indices -> scalar loss."""
    N, C = x.shape

    # Sublane packing: 8 rows for f32, 16 for bf16.
    sub = 16 if x.dtype == jnp.bfloat16 else 8
    vmem_cap = _vmem_capacity_bytes()
    block_rows = _pick_block_rows(N, C, x.dtype.itemsize, sub, vmem_cap)

    # Pad the row count so the grid tiles evenly; padded rows are sliced off
    # before the final mean, so they never affect the result.
    n_pad = _round_up(N, block_rows)
    if n_pad != N:
        x = jnp.pad(x, ((0, n_pad - N), (0, 0)))
        target = jnp.pad(target, (0, n_pad - N))
    tgt2d = target.astype(jnp.int32).reshape(n_pad, 1)

    kernel = functools.partial(
        _ls_ce_kernel,
        smoothing=float(smoothing),
        confidence=float(1.0 - smoothing),
        inv_c=float(1.0 / C),
    )

    # VMEM limit: what a single step needs (+25% slack), capped per generation
    # (<= ~48 MiB on v7x's 64 MiB VMEM, <= ~96 MiB on v5e/v6e's 128 MiB).
    est = block_rows * C * (2 * x.dtype.itemsize + 12) + 4 * C + 64 * block_rows
    cap = min((vmem_cap * 3) // 4, 100 * 2**20)
    vmem_limit = int(min(cap, max(est * 5 // 4, 32 * 2**20)))

    per_row = pl.pallas_call(
        kernel,
        out_shape=jax.ShapeDtypeStruct((n_pad, 1), jnp.float32),
        grid=(n_pad // block_rows,),
        in_specs=[
            pl.BlockSpec((block_rows, C), lambda i: (i, 0)),
            pl.BlockSpec((block_rows, 1), lambda i: (i, 0)),
        ],
        out_specs=pl.BlockSpec((block_rows, 1), lambda i: (i, 0)),
        compiler_params=pltpu.CompilerParams(
            dimension_semantics=("parallel",),   # independent per-block outputs
            vmem_limit_bytes=vmem_limit,
        ),
    )(x, tgt2d)

    # Padded rows sliced off; mean over the real N rows.
    return jnp.mean(per_row[:N, 0])


def _reference(x, target, smoothing=SMOOTHING):
    logprobs = jax.nn.log_softmax(x.astype(jnp.float32), axis=-1)
    nll = -jnp.take_along_axis(logprobs, target[:, None].astype(jnp.int32), axis=-1)[:, 0]
    smooth = -jnp.mean(logprobs, axis=-1)
    loss = (1.0 - smoothing) * nll + smoothing * smooth
    return jnp.mean(loss)


if __name__ == "__main__":
    key = jax.random.PRNGKey(0)
    kx, kt = jax.random.split(key)

    # Small batch of logits over 128 classes (even row tiling -> 2 grid steps).
    N, C = 16, 128
    x = jax.random.normal(kx, (N, C), dtype=jnp.float32)
    target = jax.random.randint(kt, (N,), 0, C, dtype=jnp.int32)

    loss = jax.block_until_ready(label_smoothing_cross_entropy(x, target))
    ref = _reference(x, target)
    assert jnp.allclose(loss, ref, atol=1e-5, rtol=1e-5), (loss, ref)

    # Non-multiple-of-8 row count exercises padding + block re-balancing.
    N2 = 10
    x2 = x[:N2]
    t2 = target[:N2]
    loss2 = jax.block_until_ready(label_smoothing_cross_entropy(x2, t2))
    ref2 = _reference(x2, t2)
    assert jnp.allclose(loss2, ref2, atol=1e-5, rtol=1e-5), (loss2, ref2)

    print("KERNEL_OK")
</pallas_src>

<mosaic_0001>
module attributes {stable_mosaic.version = 11 : i64} {
  func.func @_ls_ce_kernel(%arg0: i32, %arg1: memref<8x128xf32, #tpu.memory_space<vmem>>, %arg2: memref<8x1xi32, #tpu.memory_space<vmem>>, %arg3: memref<8x1xf32, #tpu.memory_space<vmem>>) attributes {dimension_semantics = [#tpu.dimension_semantics<parallel>], iteration_bounds = array<i64: 2>, scalar_prefetch = 0 : i64, scratch_operands = 0 : i64, tpu.core_type = #tpu.core_type<tc>, window_params = [{transform_indices = @transform_0, window_bounds = array<i64: 8, 128>}, {transform_indices = @transform_1, window_bounds = array<i64: 8, 1>}, {transform_indices = @transform_2, window_bounds = array<i64: 8, 1>}]} {
    %c0 = arith.constant 0 : index
    %c0_0 = arith.constant 0 : index
    %0 = vector.load %arg1[%c0, %c0_0] : memref<8x128xf32, #tpu.memory_space<vmem>>, vector<8x128xf32>
    %cst = arith.constant dense<0xFF800000> : vector<8xf32>
    %1 = vector.multi_reduction <maximumf>, %0, %cst [1] : vector<8x128xf32> to vector<8xf32>
    %2 = vector.shape_cast %1 : vector<8xf32> to vector<8x1xf32>
    %3 = vector.broadcast %2 : vector<8x1xf32> to vector<8x128xf32>
    %4 = arith.subf %0, %3 : vector<8x128xf32>
    %5 = math.exp %4 : vector<8x128xf32>
    %cst_1 = arith.constant dense<0.000000e+00> : vector<8xf32>
    %6 = vector.multi_reduction <add>, %5, %cst_1 [1] : vector<8x128xf32> to vector<8xf32>
    %7 = vector.shape_cast %6 : vector<8xf32> to vector<8x1xf32>
    %8 = math.log %7 : vector<8x1xf32>
    %c0_2 = arith.constant 0 : index
    %c0_3 = arith.constant 0 : index
    %9 = vector.load %arg2[%c0_2, %c0_3] : memref<8x1xi32, #tpu.memory_space<vmem>>, vector<8x1xi32>
    %10 = tpu.iota {dimensions = array<i32: 1>} : vector<1x128xi32>
    %11 = vector.broadcast %10 : vector<1x128xi32> to vector<8x128xi32>
    %12 = vector.broadcast %9 : vector<8x1xi32> to vector<8x128xi32>
    %13 = arith.cmpi eq, %11, %12 : vector<8x128xi32>
    %cst_4 = arith.constant 0.900781273 : f32
    %cst_5 = arith.constant 7.812500e-04 : f32
    %14 = vector.broadcast %cst_4 : f32 to vector<8x128xf32>
    %15 = vector.broadcast %cst_5 : f32 to vector<8x128xf32>
    %16 = arith.select %13, %14, %15 : vector<8x128xi1>, vector<8x128xf32>
    %17 = arith.mulf %16, %4 : vector<8x128xf32>
    %cst_6 = arith.constant dense<0.000000e+00> : vector<8xf32>
    %18 = vector.multi_reduction <add>, %17, %cst_6 [1] : vector<8x128xf32> to vector<8xf32>
    %19 = vector.shape_cast %18 : vector<8xf32> to vector<8x1xf32>
    %20 = arith.subf %8, %19 : vector<8x1xf32>
    %c0_7 = arith.constant 0 : index
    %c0_8 = arith.constant 0 : index
    %21 = vector.load %arg3[%c0_7, %c0_8] : memref<8x1xf32, #tpu.memory_space<vmem>>, vector<8x1xf32>
    tpu.vector_store %arg3[%c0_7, %c0_8], %20 {strides = array<i32>} : memref<8x1xf32, #tpu.memory_space<vmem>>, vector<8x1xf32>,
    return
  }
  func.func @transform_0(%arg0: i32) -> (i32, i32) {
    %c0_i32 = arith.constant 0 : i32
    %c0_i32_0 = arith.constant 0 : i32
    return %arg0, %c0_i32 : i32, i32
  }
  func.func @transform_1(%arg0: i32) -> (i32, i32) {
    %c0_i32 = arith.constant 0 : i32
    %c0_i32_0 = arith.constant 0 : i32
    return %arg0, %c0_i32 : i32, i32
  }
  func.func @transform_2(%arg0: i32) -> (i32, i32) {
    %c0_i32 = arith.constant 0 : i32
    %c0_i32_0 = arith.constant 0 : i32
    return %arg0, %c0_i32 : i32, i32
  }
}

</mosaic_0001>

<bundles_post_ra>
// kernel: tpu_custom_call.1
= control target key start
LH: loop header
LB: loop body
LE: loop exit
PB: predicated region body
PF: predicated region fallthrough
CT: control target
= control target key end

     0   :  { %s295_s9 = smov 0   ;;  %s320_s0 = inlined_call_operand.vmem [shape: f32[16,128], index: 0, kind: input, shape index: {}]   ;;  %s321_s1 = inlined_call_operand.vmem [shape: s32[16,1], index: 1, kind: input, shape index: {}]   ;;  %s322_s2 = inlined_call_operand.vmem [shape: f32[16,1], index: 2, kind: output, shape index: {}]  }
   0x1 LB: > { %s245_s10 = sadd.s32 4294967295, %s276_s9   ;;  %p249_p0 = scmp.ge.s32.totalorder %s276_s9, 1  ;;  %s276_s9 = sphi %s295_s9, %s12_s9  }
   0x2   : > { %p120_p1 = scmp.lt.s32.totalorder %s276_s9, 3 }
   0x4   : > { %p121_p2 = pnand %p249_p0, %p120_p1 }
   0x5   : > { %p144_p3 = scmp.lt.s32.totalorder (!%p121_p2), %s245_s10, 1  ;;  %v278_v0 = vmov (!%p121_p2), 0   ;;  %v167_v6 = vlaneseq (!%p121_p2)  ;;  %v279_v10 = vmov (!%p121_p2), 0.00078125   ;;  %vm178_vm1 = vcmask (!%p121_p2), 7168  }
   0x6   : > { %124 = sbr.rel (%p121_p2) target bundleno = 332 (0x14c), region = 28  ;;  %265 = vset.pattern.permute.xlu0 (!%p121_p2), %v278_v0 }
   0x7   : > { %v168_v7 = vand.u32 (!%p121_p2), 127, %v167_v6 }
   0xd   : > { %s324_s10 = smov (!%p144_p3, %s245_s10), 1 }
   0xe   : > { %s303_s11 = sshll.u32 %s324_s10, 3 }
   0xf   : > { %s147_s14 = scalar_lea.vmem %s320_s0, %s303_s11  ;;  %s151_s17 = scalar_lea.vmem %s321_s1, %s303_s11 }
  0x10   : > { %v156_v1 = vld [vmem:[%s147_s14] sm:$0xff]  ;;  %s155_s20 = scalar_lea.vmem %s322_s2, %s303_s11 }
  0x11   : > { %157 = vmax.xlane.f32.xlu0 %v156_v1  ;;  %v166_v2 = vld [vmem:[%s151_s17] sm:$0xff] }
  0x27   : > { %170 = vperm.xlu0 %265, %v166_v2  }
  0x9e   : > { %v158_v3 = vpop.xlane.xlu0 %157 }
  0x9f   : > { %v159_v4 = vsub.f32 %v156_v1, %v158_v3 }
  0xa1   : > { %v160_v5 = vmul.f32 1.442695, %v159_v4 }
  0xa3   : > { %266 = vpow2.f32 %v160_v5 }
  0xa6   : > { %v171_v8 = vpop.permute.xlu0 %170 }
  0xa7   : > { %vm172_vm0 = vcmp.eq.s32.totalorder %v168_v7, %v171_v8 }
  0xa8   : > { %v173_v11 = vsel %vm172_vm0, 0.9007813, %v279_v10 }
  0xa9   : > { %v174_v12 = vmul.f32 %v173_v11, %v159_v4 }
  0xad   : > { %v267_v9 = vpop.eup %266 }
  0xae   : > { %162 = vadd.xlane.f32.xlu1 %v267_v9 }
  0xb2   : > { %175 = vadd.xlane.f32.xlu1 %v174_v12 }
 0x13b   : > { %v163_v13 = vpop.xlane.xlu1 %162 }
 0x13c   : > { %268 = vlog2.f32 %v163_v13 }
 0x13f   : > { %v176_v16 = vpop.xlane.xlu1 %175 }
 0x146   : > { %v269_v14 = vpop.eup %268 }
 0x147   : > { %v165_v15 = vmul.f32 0.6931472, %v269_v14 }
 0x149   : > { %v177_v17 = vsub.f32 %v165_v15, %v176_v16 }
 0x14b   : > { %179 = vst.msk [vmem:[%s155_s20] sm:$0xff] %vm178_vm1, %v177_v17 }
 0x14c PF: > { %s12_s9 = sadd.s32 1, %s276_s9  }
 0x14d   : > { %p9_p4 = scmp.ge.s32.totalorder %s12_s9, 4  }
 0x14f   :  { %11 = sbr.rel (!%p9_p4) target bundleno = 1 (0x1), region = 61 }

</bundles_post_ra>
